<compile_context>
chip_gen: v6e
topology: v6e:2x2x1
jax: 0.10.0
libtpu: 0.0.40
codegen_flags: <defaults>
</compile_context>

<pallas_src>
import jax
import jax.numpy as jnp
from jax.experimental import pallas as pl
from jax.experimental.pallas import tpu as pltpu

LANE = 128
SUBLANE = 8


def _round_up(x, m):
    return (x + m - 1) // m * m


def _vmem_budget_bytes():
    """~75% of this chip's physical VMEM (fallback assumption: 64 MiB)."""
    cap = 64 * 1024 * 1024
    try:
        info = pltpu.get_tpu_info()
        cap = int(getattr(info, "vmem_capacity_bytes", cap))
    except Exception:
        pass
    return cap * 3 // 4


def _pick_tb(B, max_tb):
    """Batch-tile rows: as big as allowed; multiple of 8 unless == B."""
    max_tb = max(SUBLANE, max_tb // SUBLANE * SUBLANE)
    if B <= max_tb:
        # Two exact batch tiles when B allows it -> both v7x TensorCores busy.
        if B >= 16 and B % 16 == 0:
            return B // 2
        return B
    return max_tb


# --------------------------------------------------------------------------
# Kernels
# --------------------------------------------------------------------------
def _linear_resident_kernel(x_ref, w_ref, b_ref, o_ref):
    """o = x @ W + b with the whole weight resident in VMEM (no K axis).

    x_ref : (tb, K_pad)    f32   activation tile (cast to bf16 in-kernel)
    w_ref : (K_pad, N_pad) bf16  full pre-transposed weight (resident)
    b_ref : (1, N_pad)     f32   bias (resident, lane-dense)
    o_ref : (tb, N_pad)    f32   output tile
    """
    x = x_ref[...].astype(w_ref.dtype)                  # f32 -> bf16 on the VPU
    o_ref[...] = (
        jnp.dot(x, w_ref[...], preferred_element_type=jnp.float32) + b_ref[...]
    )


def _linear_ktiled_kernel(x_ref, w_ref, b_ref, o_ref):
    """Fallback for weights too large to keep resident: stream W in K tiles
    and accumulate directly into the resident f32 output block."""
    k = pl.program_id(1)

    @pl.when(k == 0)
    def _init():
        # Bias is the initial value of the accumulator -> added exactly once.
        o_ref[...] = jnp.broadcast_to(b_ref[...], o_ref.shape)

    x = x_ref[...].astype(w_ref.dtype)
    o_ref[...] += jnp.dot(x, w_ref[...], preferred_element_type=jnp.float32)


# --------------------------------------------------------------------------
# Parameter prep (one-time, OUTSIDE the per-step forward path)
# --------------------------------------------------------------------------
def prepare_params(weight, bias, *, weight_dtype=jnp.bfloat16):
    """weight: (num_outputs, num_inputs) f32 (nn.Linear convention),
    bias: (num_outputs,) f32.
    Returns w_prep (K_pad, N_pad) bf16 (transposed + zero-padded) and
    b_prep (1, N_pad) f32 (zero-padded, lane-dense)."""
    num_outputs, num_inputs = weight.shape
    k_pad = _round_up(num_inputs, LANE)
    n_pad = _round_up(num_outputs, LANE)
    w_prep = jnp.zeros((k_pad, n_pad), dtype=weight_dtype)
    w_prep = w_prep.at[:num_inputs, :num_outputs].set(weight.T.astype(weight_dtype))
    b_prep = jnp.zeros((1, n_pad), dtype=jnp.float32)
    b_prep = b_prep.at[0, :num_outputs].set(bias.astype(jnp.float32))
    return w_prep, b_prep


# --------------------------------------------------------------------------
# Forward pass:  y = linear(x.view(B, -1))
# --------------------------------------------------------------------------
def linear_net_forward(x_nchw, w_prep, b_prep, num_outputs):
    B = x_nchw.shape[0]
    x_flat = x_nchw.reshape(B, -1)              # row-major == torch .view(B, -1)
    K = x_flat.shape[1]
    K_pad, N_pad = w_prep.shape

    # Only materialize a padded copy of x when K is not 128-aligned
    # (rare: C*H*W is usually already a multiple of 128 — demo: 1024).
    if K_pad != K:
        x_in = jnp.zeros((B, K_pad), x_flat.dtype).at[:, :K].set(x_flat)
    else:
        x_in = x_flat

    budget = _vmem_budget_bytes()
    w_bytes = K_pad * N_pad * w_prep.dtype.itemsize
    b_bytes = N_pad * 4

    if 2 * (w_bytes + b_bytes) <= budget // 2:
        # ---- Fast path: weight fully VMEM-resident, no K grid axis. --------
        row_bytes = 2 * (K_pad * 4 + N_pad * 4)          # dbl-buffered x + out
        max_tb = min(512, max(SUBLANE,
                              (budget - 2 * (w_bytes + b_bytes)) // row_bytes))
        tb = _pick_tb(B, max_tb)
        grid = (pl.cdiv(B, tb),)
        kernel = _linear_resident_kernel
        in_specs = [
            pl.BlockSpec((tb, K_pad), lambda i: (i, 0)),       # x tile (f32)
            pl.BlockSpec((K_pad, N_pad), lambda i: (0, 0)),    # W, resident
            pl.BlockSpec((1, N_pad), lambda i: (0, 0)),        # bias, resident
        ]
        out_specs = pl.BlockSpec((tb, N_pad), lambda i: (i, 0))
        dim_sem = ("parallel",)
        w_streams = 1
    else:
        # ---- Fallback: stream W over K, accumulate into resident output. ---
        tb = _pick_tb(B, 256)
        fixed = 2 * tb * N_pad * 4 + 2 * b_bytes
        per_tk = 2 * (N_pad * w_prep.dtype.itemsize + tb * 4)
        tk_cap = max(LANE, (budget - fixed) // per_tk)
        tk = LANE
        start = min(2048, K_pad, tk_cap) // LANE * LANE
        for cand in range(start, LANE - 1, -LANE):
            if K_pad % cand == 0:
                tk = cand
                break
        grid = (pl.cdiv(B, tb), K_pad // tk)               # reduction axis last
        kernel = _linear_ktiled_kernel
        in_specs = [
            pl.BlockSpec((tb, tk), lambda i, k: (i, k)),       # x tile (f32)
            pl.BlockSpec((tk, N_pad), lambda i, k: (k, 0)),    # W tile
            pl.BlockSpec((1, N_pad), lambda i, k: (0, 0)),     # bias
        ]
        out_specs = pl.BlockSpec((tb, N_pad), lambda i, k: (i, 0))
        dim_sem = ("parallel", "arbitrary")
        w_streams = pl.cdiv(B, tb)

    cost = pl.CostEstimate(
        flops=2 * B * K_pad * N_pad,
        transcendentals=0,
        bytes_accessed=(B * K_pad * 4                              # x (f32)
                        + w_streams * w_bytes                      # W (bf16)
                        + b_bytes                                  # bias
                        + B * N_pad * 4),                          # out (f32)
    )

    y_pad = pl.pallas_call(
        kernel,
        out_shape=jax.ShapeDtypeStruct((B, N_pad), jnp.float32),
        grid_spec=pltpu.PrefetchScalarGridSpec(
            num_scalar_prefetch=0,
            grid=grid,
            in_specs=in_specs,
            out_specs=out_specs,
        ),
        compiler_params=pltpu.CompilerParams(
            dimension_semantics=dim_sem,
            vmem_limit_bytes=int(budget),
        ),
        cost_estimate=cost,
    )(x_in, w_prep, b_prep)

    return y_pad[:, :num_outputs]


# --------------------------------------------------------------------------
if __name__ == "__main__":
    # Small shapes consistent with the module: x = (B, C, H, W) flattened to
    # num_inputs = C*H*W; num_outputs small.
    B, C, H, W = 2, 4, 16, 16
    num_inputs = C * H * W          # 1024
    num_outputs = 32

    key = jax.random.PRNGKey(0)
    kx, kw, kb = jax.random.split(key, 3)

    x = jax.random.normal(kx, (B, C, H, W), dtype=jnp.float32)

    # Deterministic init mimicking nn.Linear: U(-1/sqrt(in), 1/sqrt(in))
    bound = 1.0 / jnp.sqrt(jnp.float32(num_inputs))
    weight = jax.random.uniform(
        kw, (num_outputs, num_inputs), dtype=jnp.float32,
        minval=-bound, maxval=bound)
    bias = jax.random.uniform(
        kb, (num_outputs,), dtype=jnp.float32, minval=-bound, maxval=bound)

    # One-time parameter prep (transpose + pad + bf16 cast), outside the
    # per-step forward path — no per-call weight transpose / padding.
    w_prep, b_prep = prepare_params(weight, bias)

    fwd = jax.jit(linear_net_forward, static_argnums=(3,))
    y = fwd(x, w_prep, b_prep, num_outputs)
    jax.block_until_ready(y)

    # Reference 1: same bf16-operand math in plain JAX (tight tolerance —
    # checks the kernel itself).
    x_bf = x.reshape(B, -1).astype(jnp.bfloat16).astype(jnp.float32)
    w_bf = weight.T.astype(jnp.bfloat16).astype(jnp.float32)
    y_ref_bf16 = x_bf @ w_bf + bias
    # Reference 2: full-f32 PyTorch semantics (loose tolerance — bf16 operand
    # rounding is the only difference).
    y_ref_f32 = x.reshape(B, -1) @ weight.T + bias

    assert y.shape == (B, num_outputs)
    assert jnp.allclose(y, y_ref_bf16, atol=1e-4, rtol=1e-4), \
        float(jnp.max(jnp.abs(y - y_ref_bf16)))
    assert jnp.allclose(y, y_ref_f32, atol=2e-2, rtol=2e-2), \
        float(jnp.max(jnp.abs(y - y_ref_f32)))

    print("KERNEL_OK")
</pallas_src>

<mosaic_0001>
module attributes {stable_mosaic.version = 11 : i64} {
  func.func @_linear_resident_kernel(%arg0: i32, %arg1: memref<2x1024xf32, #tpu.memory_space<vmem>>, %arg2: memref<1024x128xbf16, #tpu.memory_space<vmem>>, %arg3: memref<1x128xf32, #tpu.memory_space<vmem>>, %arg4: memref<2x128xf32, #tpu.memory_space<vmem>>) attributes {dimension_semantics = [#tpu.dimension_semantics<parallel>], iteration_bounds = array<i64: 1>, scalar_prefetch = 0 : i64, scratch_operands = 0 : i64, tpu.core_type = #tpu.core_type<tc>, window_params = [{transform_indices = @transform_0, window_bounds = array<i64: 2, 1024>}, {pipeline_mode = #tpu.pipeline_mode<synchronous>, transform_indices = @transform_1, window_bounds = array<i64: 1024, 128>}, {pipeline_mode = #tpu.pipeline_mode<synchronous>, transform_indices = @transform_2, window_bounds = array<i64: 1, 128>}, {transform_indices = @transform_3, window_bounds = array<i64: 2, 128>}]} {
    %c0 = arith.constant 0 : index
    %c0_0 = arith.constant 0 : index
    %0 = vector.load %arg1[%c0, %c0_0] : memref<2x1024xf32, #tpu.memory_space<vmem>>, vector<2x1024xf32>
    %1 = arith.truncf %0 : vector<2x1024xf32> to vector<2x1024xbf16>
    %c0_1 = arith.constant 0 : index
    %c0_2 = arith.constant 0 : index
    %2 = vector.load %arg2[%c0_1, %c0_2] : memref<1024x128xbf16, #tpu.memory_space<vmem>>, vector<1024x128xbf16>
    %cst = arith.constant dense<0.000000e+00> : vector<2x128xf32>
    %3 = tpu.matmul %1, %2, %cst {dimension_numbers = #tpu.dot_dimension_numbers<[1], [0], [0], [1], [0, 0, 1, 1], [], []>} : vector<2x1024xbf16>, vector<1024x128xbf16>, vector<2x128xf32> -> vector<2x128xf32>
    %c0_3 = arith.constant 0 : index
    %c0_4 = arith.constant 0 : index
    %4 = vector.load %arg3[%c0_3, %c0_4] : memref<1x128xf32, #tpu.memory_space<vmem>>, vector<1x128xf32>
    %5 = vector.broadcast %4 : vector<1x128xf32> to vector<2x128xf32>
    %6 = arith.addf %3, %5 : vector<2x128xf32>
    %c0_5 = arith.constant 0 : index
    %c0_6 = arith.constant 0 : index
    %7 = vector.load %arg4[%c0_5, %c0_6] : memref<2x128xf32, #tpu.memory_space<vmem>>, vector<2x128xf32>
    tpu.vector_store %arg4[%c0_5, %c0_6], %6 {strides = array<i32>} : memref<2x128xf32, #tpu.memory_space<vmem>>, vector<2x128xf32>,
    return
  }
  func.func @transform_0(%arg0: i32) -> (i32, i32) {
    %c0_i32 = arith.constant 0 : i32
    %c0_i32_0 = arith.constant 0 : i32
    return %arg0, %c0_i32 : i32, i32
  }
  func.func @transform_1(%arg0: i32) -> (i32, i32) {
    %c0_i32 = arith.constant 0 : i32
    %c0_i32_0 = arith.constant 0 : i32
    %c0_i32_1 = arith.constant 0 : i32
    return %c0_i32, %c0_i32_0 : i32, i32
  }
  func.func @transform_2(%arg0: i32) -> (i32, i32) {
    %c0_i32 = arith.constant 0 : i32
    %c0_i32_0 = arith.constant 0 : i32
    %c0_i32_1 = arith.constant 0 : i32
    return %c0_i32, %c0_i32_0 : i32, i32
  }
  func.func @transform_3(%arg0: i32) -> (i32, i32) {
    %c0_i32 = arith.constant 0 : i32
    %c0_i32_0 = arith.constant 0 : i32
    return %arg0, %c0_i32 : i32, i32
  }
}

</mosaic_0001>

<bundles_post_ra>
// kernel: linear_net_forward.1
= control target key start
LH: loop header
LB: loop body
LE: loop exit
PB: predicated region body
PF: predicated region fallthrough
CT: control target
= control target key end

     0   :  { %8 = vsyncpa [#allocation3], 0  ;;  %s1093_s0 = inlined_call_operand.vmem [shape: f32[2,1024], index: 0, kind: input, shape index: {}]   ;;  %s1094_s1 = inlined_call_operand.hbm [shape: bf16[1024,128], index: 1, kind: input, shape index: {}]   ;;  %s1095_s2 = inlined_call_operand.vmem [shape: f32[1,128], index: 2, kind: input, shape index: {}]   ;;  %s1096_s3 = inlined_call_operand.hbm [shape: f32[2,128], index: 3, kind: output, shape index: {}]  }
   0x1   :  { %9 = vsyncpa [#allocation4], 0  ;;  %s1047_s12 = smov [#allocation2]  }
   0x2   :  { %s17_s13 = sshll.u32 %s1047_s12, 4  ;;  %s18_s13 = int_to_ptr.vmem [resolvable:$true] %s17_s13 }
   0x3   :  { %s1011_s14 = scalar_lea.vmem %s18_s13, 8192  ;;  %p1016_p1 = scmp.lt.s32.totalorder %s18_s13, %s18_s13 }
   0x4   :  { %p1012_p0 = scmp.ne.s32.totalorder %s18_s13, %s1011_s14  ;;  %p1017_p2 = scmp.lt.s32.totalorder %s1011_s14, %s1011_s14 }
   0x6   :  { %p1018_p3 = por %p1017_p2, %p1016_p1 }
   0x8   :  { %p1019_p4 = pnand %p1018_p3, %p1012_p0 }
   0xa   :  { %1022 = shalt.err (!%p1019_p4)
}
   0xb   :  { %s1048_s15 = smov 64   ;;  %s1049_s16 = smov 4  }
   0xc   :  { %23 = dma.hbm_to_vmem [thread:$0]  %s1094_s1, 8192, %s18_s13, [#allocation3], %s1048_s15, %s1048_s15, %s1049_s16  }
   0xd   :  { %1043 = dma.done.wait [#allocation3], 8192  }
   0xe   :  { %1044 = vsyncadd [#allocation3], 4294959104  ;;  %v937_v0 = vld [vmem:[#allocation2 + $0x78] sm:$0xff]   ;;  %v941_v4 = vld [vmem:[#allocation2 + $0x70] sm:$0xff]   ;;  %v1050_v22 = vmov 1983009808   ;;  %v38_v24 = vlaneseq }
   0xf   :  { %v938_v1 = vld [vmem:[#allocation2 + $0xf8] sm:$0xff]   ;;  %844 = vmatprep.subr.bf16.mxu0 %v937_v0  ;;  %v942_v5 = vld [vmem:[#allocation2 + $0xf0] sm:$0xff]   ;;  %v945_v8 = vld [vmem:[#allocation2 + $0x68] sm:$0xff]   ;;  %v36_v23 = vunpack.c.l.s4 %v1050_v22  ;;  %s1051_s23 = smov [#allocation5]  }
  0x10   :  { %v939_v2 = vld [vmem:[#allocation2 + $0x38] sm:$0xff]   ;;  %866 = vmatprep.subr.bf16.mxu1 %v938_v1  ;;  %v943_v6 = vld [vmem:[#allocation2 + $0x30] sm:$0xff]   ;;  %v946_v9 = vld [vmem:[#allocation2 + $0xe8] sm:$0xff]   ;;  %v39_v30 = vshrl.u32 %v38_v24, 7  ;;  %s770_s24 = sshll.u32 %s1051_s23, 4  ;;  %s771_s24 = int_to_ptr.vmem [resolvable:$true] %s770_s24 }
  0x11   :  { %v940_v3 = vld [vmem:[#allocation2 + $0xb8] sm:$0xff]   ;;  %845 = vmatpush3.bf16.msra.mxu0 %v939_v2  ;;  %v944_v7 = vld [vmem:[#allocation2 + $0xb0] sm:$0xff]   ;;  %v947_v10 = vld [vmem:[#allocation2 + $0x28] sm:$0xff]   ;;  %v37_v29 = vunpack.c.0.s8 %v36_v23  ;;  %p1028_p6 = scmp.lt.s32.totalorder %s771_s24, %s771_s24 }
  0x12   :  { %867 = vmatpush3.bf16.msra.mxu1 %v940_v3  ;;  %846 = vmatprep.subr.bf16.mxu0 %v941_v4  ;;  %v948_v11 = vld [vmem:[#allocation2 + $0xa8] sm:$0xff]   ;;  %v949_v12 = vld [vmem:[#allocation2 + $0x60] sm:$0xff]   ;;  %v953_v16 = vld [vmem:[#allocation2 + $0x58] sm:$0xff]  }
  0x13   :  { %868 = vmatprep.subr.bf16.mxu1 %v942_v5  ;;  %v950_v13 = vld [vmem:[#allocation2 + $0xe0] sm:$0xff]   ;;  %v954_v17 = vld [vmem:[#allocation2 + $0xd8] sm:$0xff]   ;;  %v957_v20 = vld [vmem:[#allocation2 + $0x50] sm:$0xff]   ;;  %v1075_v35 = vsub.s32 %v37_v29, %v39_v30 }
  0x14   :  { %v951_v14 = vld [vmem:[#allocation2 + $0x20] sm:$0xff]   ;;  %v955_v18 = vld [vmem:[#allocation2 + $0x18] sm:$0xff]   ;;  %v958_v21 = vld [vmem:[#allocation2 + $0xd0] sm:$0xff]  }
  0x15   :  { %847 = vmatpush3.bf16.msra.mxu0 %v943_v6  ;;  %v952_v15 = vld [vmem:[#allocation2 + $0xa0] sm:$0xff]   ;;  %v956_v19 = vld [vmem:[#allocation2 + $0x98] sm:$0xff]   ;;  %v959_v25 = vld [vmem:[#allocation2 + $0x10] sm:$0xff]  }
  0x16   :  { %869 = vmatpush3.bf16.msra.mxu1 %v944_v7  ;;  %848 = vmatprep.subr.bf16.mxu0 %v945_v8  ;;  %v960_v26 = vld [vmem:[#allocation2 + $0x90] sm:$0xff]   ;;  %v961_v27 = vld [vmem:[#allocation2 + $0x48] sm:$0xff]   ;;  %v965_v33 = vld [vmem:[#allocation2 + $0x40] sm:$0xff]  }
  0x17   :  { %870 = vmatprep.subr.bf16.mxu1 %v946_v9  ;;  %v962_v28 = vld [vmem:[#allocation2 + $0xc8] sm:$0xff]   ;;  %v966_v34 = vld [vmem:[#allocation2 + $0xc0] sm:$0xff]   ;;  %v970_v41 = vld [vmem:[#allocation2 + $0x178] sm:$0xff]  }
  0x18   :  { %v963_v31 = vld [vmem:[#allocation2 + $0x8] sm:$0xff]   ;;  %v967_v36 = vld [vmem:[#allocation2] sm:$0xff]   ;;  %v971_v42 = vld [vmem:[#allocation2 + $0x1f8] sm:$0xff]  }
  0x19   :  { %849 = vmatpush3.bf16.msra.mxu0 %v947_v10  ;;  %v964_v32 = vld [vmem:[#allocation2 + $0x88] sm:$0xff]   ;;  %v968_v37 = vld [vmem:[#allocation2 + $0x80] sm:$0xff]   ;;  %v972_v48 = vld [vmem:[#allocation2 + $0x138] sm:$0xff]  }
  0x1a   :  { %871 = vmatpush3.bf16.msra.mxu1 %v948_v11  ;;  %850 = vmatprep.subr.bf16.mxu0 %v949_v12  ;;  %v30_v38 = vld [vmem:[%s1093_s0] sm:$0xff]  ;;  %v974_v50 = vld [vmem:[#allocation2 + $0x170] sm:$0xff]   ;;  %v973_v52 = vld [vmem:[#allocation2 + $0x1b8] sm:$0xff]  }
  0x1b   :  { %872 = vmatprep.subr.bf16.mxu1 %v950_v13  ;;  %v41_v39 = vrot.slane %v30_v38, %v1075_v35  ;;  %v34_v40 = vcombine.high %v30_v38, %v30_v38  ;;  %v975_v53 = vld [vmem:[#allocation2 + $0x1f0] sm:$0xff]   ;;  %v978_v55 = vld [vmem:[#allocation2 + $0x168] sm:$0xff]   ;;  %v982_v59 = vld [vmem:[#allocation2 + $0x160] sm:$0xff]  }
  0x1c   :  { %v976_v54 = vld [vmem:[#allocation2 + $0x130] sm:$0xff]   ;;  %v979_v57 = vld [vmem:[#allocation2 + $0x1e8] sm:$0xff]   ;;  %v983_v61 = vld [vmem:[#allocation2 + $0x1e0] sm:$0xff]  }
  0x1d   :  { %851 = vmatpush3.bf16.msra.mxu0 %v951_v14  ;;  %v49_v43 = vcombine.high %v41_v39, %v41_v39  ;;  %v48_v44 = vrot.slane %v34_v40, %v1075_v35  ;;  %v76_v45 = vpack.c.bf16 %v41_v39, %v41_v39  ;;  %v977_v56 = vld [vmem:[#allocation2 + $0x1b0] sm:$0xff]   ;;  %v980_v58 = vld [vmem:[#allocation2 + $0x128] sm:$0xff]   ;;  %v984_v62 = vld [vmem:[#allocation2 + $0x120] sm:$0xff]  }
  0x1e   :  { %873 = vmatpush3.bf16.msra.mxu1 %v952_v15  ;;  %852 = vmatprep.subr.bf16.mxu0 %v953_v16  ;;  %v981_v60 = vld [vmem:[#allocation2 + $0x1a8] sm:$0xff]   ;;  %v986_v63 = vld [vmem:[#allocation2 + $0x158] sm:$0xff]   ;;  %v985_v0 = vld [vmem:[#allocation2 + $0x1a0] sm:$0xff]  }
  0x1f   :  { %874 = vmatprep.subr.bf16.mxu1 %v954_v17  ;;  %v77_v46 = vpack.c.bf16 %v49_v43, %v49_v43  ;;  %v50_v47 = vcombine.high %v48_v44, %v48_v44  ;;  %v78_v49 = vpack.c.bf16 %v48_v44, %v48_v44  ;;  %v987_v1 = vld [vmem:[#allocation2 + $0x1d8] sm:$0xff]   ;;  %v990_v3 = vld [vmem:[#allocation2 + $0x150] sm:$0xff]   ;;  %v994_v7 = vld [vmem:[#allocation2 + $0x148] sm:$0xff]  }
  0x20   :  { %v988_v2 = vld [vmem:[#allocation2 + $0x118] sm:$0xff]   ;;  %v991_v5 = vld [vmem:[#allocation2 + $0x1d0] sm:$0xff]   ;;  %v995_v9 = vld [vmem:[#allocation2 + $0x1c8] sm:$0xff]  }
  0x21   :  { %853 = vmatpush3.bf16.msra.mxu0 %v955_v18  ;;  %635 = vmatprep.mubr.bf16.mxu0 %v77_v46  ;;  %v79_v51 = vpack.c.bf16 %v50_v47, %v50_v47  ;;  %v989_v4 = vld [vmem:[#allocation2 + $0x198] sm:$0xff]   ;;  %v992_v6 = vld [vmem:[#allocation2 + $0x110] sm:$0xff]   ;;  %v996_v10 = vld [vmem:[#allocation2 + $0x108] sm:$0xff]  }
  0x22   :  { %875 = vmatpush3.bf16.msra.mxu1 %v956_v19  ;;  %854 = vmatprep.subr.bf16.mxu0 %v957_v20  ;;  %v993_v8 = vld [vmem:[#allocation2 + $0x190] sm:$0xff]   ;;  %v998_v11 = vld [vmem:[#allocation2 + $0x140] sm:$0xff]   ;;  %v997_v12 = vld [vmem:[#allocation2 + $0x188] sm:$0xff]  }
  0x23   :  { %876 = vmatprep.subr.bf16.mxu1 %v958_v21  ;;  %675 = vmatprep.mubr.bf16.mxu1 %v79_v51  ;;  %v999_v13 = vld [vmem:[#allocation2 + $0x1c0] sm:$0xff]   ;;  %v31_v14 = vld [vmem:[%s1093_s0 + $0x8] sm:$0xff] }
  0x24   :  { %v1000_v15 = vld [vmem:[#allocation2 + $0x100] sm:$0xff]   ;;  %v58_v16 = vrot.slane %v31_v14, %v1075_v35  ;;  %v51_v17 = vcombine.high %v31_v14, %v31_v14 }
  0x25   :  { %855 = vmatpush3.bf16.msra.mxu0 %v959_v25  ;;  %v1001_v18 = vld [vmem:[#allocation2 + $0x180] sm:$0xff]  }
  0x26   :  { %877 = vmatpush3.bf16.msra.mxu1 %v960_v26  ;;  %856 = vmatprep.subr.bf16.mxu0 %v961_v27  ;;  %v66_v19 = vcombine.high %v58_v16, %v58_v16  ;;  %v65_v20 = vrot.slane %v51_v17, %v1075_v35  ;;  %v80_v21 = vpack.c.bf16 %v58_v16, %v58_v16  ;;  %v779_v35 = vld [vmem:[%s1095_s2] ss:$0 sm:$0xff]  ;;  %s1023_s2 = scalar_lea.vmem %s771_s24, 32 }
  0x27   :  { %878 = vmatprep.subr.bf16.mxu1 %v962_v28  ;;  %p1024_p5 = scmp.ne.s32.totalorder %s771_s24, %s1023_s2  ;;  %p1029_p7 = scmp.lt.s32.totalorder %s1023_s2, %s1023_s2 }
  0x28   :  { %v81_v22 = vpack.c.bf16 %v66_v19, %v66_v19  ;;  %v67_v23 = vcombine.high %v65_v20, %v65_v20  ;;  %v82_v24 = vpack.c.bf16 %v65_v20, %v65_v20 }
  0x29   :  { %857 = vmatpush3.bf16.msra.mxu0 %v963_v31  ;;  %p1030_p8 = por %p1029_p7, %p1028_p6 }
  0x2a   :  { %879 = vmatpush3.bf16.msra.mxu1 %v964_v32  ;;  %858 = vmatprep.subr.bf16.mxu0 %v965_v33  ;;  %v83_v25 = vpack.c.bf16 %v67_v23, %v67_v23 }
  0x2b   :  { %880 = vmatprep.subr.bf16.mxu1 %v966_v34  ;;  %p1031_p9 = pnand %p1030_p8, %p1024_p5 }
  0x2d   :  { %859 = vmatpush3.bf16.msra.mxu0 %v967_v36 }
  0x2e   :  { %881 = vmatpush3.bf16.msra.mxu1 %v968_v37  ;;  %888 = vmatprep.subr.bf16.mxu0 %v970_v41 }
  0x2f   :  { %910 = vmatprep.subr.bf16.mxu1 %v971_v42 }
  0x30   :  { %636 = vmatmul.mubr.bf16.vlgmr.msra.gmra.mxu0 %v76_v45 }
  0x31   :  { %889 = vmatpush3.bf16.msra.mxu0 %v972_v48  ;;  %676 = vmatmul.mubr.bf16.vlgmr.msra.gmra.mxu1 %v78_v49 }
  0x32   :  { %890 = vmatprep.subr.bf16.mxu0 %v974_v50  ;;  %911 = vmatpush3.bf16.msra.mxu1 %v973_v52 }
  0x33   :  { %912 = vmatprep.subr.bf16.mxu1 %v975_v53  ;;  %715 = vmatprep.mubr.bf16.mxu0 %v81_v22 }
  0x34   :  { %755 = vmatprep.mubr.bf16.mxu1 %v83_v25 }
  0x35   :  { %891 = vmatpush3.bf16.msra.mxu0 %v976_v54 }
  0x36   :  { %892 = vmatprep.subr.bf16.mxu0 %v978_v55  ;;  %913 = vmatpush3.bf16.msra.mxu1 %v977_v56 }
  0x37   :  { %914 = vmatprep.subr.bf16.mxu1 %v979_v57 }
  0x39   :  { %893 = vmatpush3.bf16.msra.mxu0 %v980_v58 }
  0x3a   :  { %894 = vmatprep.subr.bf16.mxu0 %v982_v59  ;;  %915 = vmatpush3.bf16.msra.mxu1 %v981_v60 }
  0x3b   :  { %916 = vmatprep.subr.bf16.mxu1 %v983_v61 }
  0x3d   :  { %895 = vmatpush3.bf16.msra.mxu0 %v984_v62 }
  0x3e   :  { %896 = vmatprep.subr.bf16.mxu0 %v986_v63  ;;  %917 = vmatpush3.bf16.msra.mxu1 %v985_v0 }
  0x3f   :  { %918 = vmatprep.subr.bf16.mxu1 %v987_v1 }
  0x41   :  { %897 = vmatpush3.bf16.msra.mxu0 %v988_v2 }
  0x42   :  { %898 = vmatprep.subr.bf16.mxu0 %v990_v3  ;;  %919 = vmatpush3.bf16.msra.mxu1 %v989_v4 }
  0x43   :  { %920 = vmatprep.subr.bf16.mxu1 %v991_v5 }
  0x45   :  { %899 = vmatpush3.bf16.msra.mxu0 %v992_v6 }
  0x46   :  { %900 = vmatprep.subr.bf16.mxu0 %v994_v7  ;;  %921 = vmatpush3.bf16.msra.mxu1 %v993_v8 }
  0x47   :  { %922 = vmatprep.subr.bf16.mxu1 %v995_v9 }
  0x49   :  { %901 = vmatpush3.bf16.msra.mxu0 %v996_v10 }
  0x4a   :  { %902 = vmatprep.subr.bf16.mxu0 %v998_v11  ;;  %923 = vmatpush3.bf16.msra.mxu1 %v997_v12 }
  0x4b   :  { %924 = vmatprep.subr.bf16.mxu1 %v999_v13 }
  0x4d   :  { %903 = vmatpush3.bf16.msra.mxu0 %v1000_v15 }
  0x4e   :  { %925 = vmatpush3.bf16.msra.mxu1 %v1001_v18 }
  0x50   :  { %716 = vmatmul.mubr.bf16.vlgmr.msra.gmra.mxu0 %v80_v21 }
  0x51   :  { %756 = vmatmul.mubr.bf16.vlgmr.msra.gmra.mxu1 %v82_v24 }
  0xf0   :  { %v860_v26 = vpop.f32.mrf.mxu0 }
  0xf1   :  { %v882_v27 = vpop.f32.mrf.mxu1 }
  0xf2   :  { %v861_v28 = vpop.f32.mrf.mxu0 }
  0xf3   :  { %v883_v29 = vpop.f32.mrf.mxu1  ;;  %v862_v34 = vadd.f32 %v861_v28, %v860_v26 }
  0xf4   :  { %v863_v30 = vpop.f32.mrf.mxu0  ;;  %v884_v37 = vadd.f32 %v883_v29, %v882_v27 }
  0xf5   :  { %v885_v31 = vpop.f32.mrf.mxu1  ;;  %v638_v36 = vadd.f32 %v862_v34, %v779_v35 }
  0xf6   :  { %v864_v32 = vpop.f32.mrf.mxu0 }
  0xf7   :  { %v886_v33 = vpop.f32.mrf.mxu1  ;;  %v678_v41 = vadd.f32 %v884_v37, %v638_v36 }
 0x110   :  { %v904_v38 = vpop.f32.mrf.mxu0 }
 0x111   :  { %v926_v39 = vpop.f32.mrf.mxu1 }
 0x112   :  { %v905_v40 = vpop.f32.mrf.mxu0 }
 0x113   :  { %v906_v42 = vadd.f32 %v905_v40, %v904_v38  ;;  %v927_v43 = vpop.f32.mrf.mxu1 }
 0x114   :  { %v907_v44 = vpop.f32.mrf.mxu0  ;;  %v928_v46 = vadd.f32 %v927_v43, %v926_v39 }
 0x115   :  { %v718_v45 = vadd.f32 %v906_v42, %v678_v41  ;;  %v929_v47 = vpop.f32.mrf.mxu1 }
 0x116   :  { %v908_v48 = vpop.f32.mrf.mxu0 }
 0x117   :  { %v758_v49 = vadd.f32 %v928_v46, %v718_v45  ;;  %v930_v50 = vpop.f32.mrf.mxu1 }
 0x119   :  { %763 = vst [vmem:[#allocation5] sm:$0x3] %v758_v49 }
 0x11a   :  { %1034 = shalt.err (!%p1031_p9)
}
 0x11b   :  { %773 = dma.vmem_to_hbm [thread:$0]  %s771_s24, 32, %s1096_s3, [#allocation4]  }
 0x11c   :  { %1045 = dma.done.wait [#allocation4], 32  }
 0x11d   :  { %1046 = vsyncadd [#allocation4], 4294967264 }
 0x11e   :  { %777 = vsyncpa [#allocation3], 1 }
 0x11f   :  { %778 = vsyncpa [#allocation4], 1 }

</bundles_post_ra>
